<compile_context>
chip_gen: v7x
topology: tpu7x:2x2x1
jax: 0.10.0
libtpu: 0.0.40
codegen_flags: <defaults>
</compile_context>

<pallas_src>
import jax
import jax.numpy as jnp
from jax.experimental import pallas as pl
from jax.experimental.pallas import tpu as pltpu


def value_net_kernel(x_ref, w1_ref, b1_ref, w2_ref, b2_ref, o_ref):
    # fc1: (TILE_B, S) @ (S, H) on the MXU, f32 accumulate.
    h = jnp.dot(x_ref[...], w1_ref[...], preferred_element_type=jnp.float32)
    # Single (1, H) broadcast bias add + ReLU in f32 (VPU).
    h = jnp.maximum(h + b1_ref[...], 0.0)
    # fc2 (out_features = 1): VPU multiply + lane reduction instead of an MXU
    # matmul that would use 1 of 256 output columns.
    v = jnp.sum(h * w2_ref[...], axis=-1, keepdims=True)
    # b2 is a scalar living in SMEM.
    o_ref[...] = v + b2_ref[0, 0]


def _round_up(n: int, m: int) -> int:
    return ((n + m - 1) // m) * m


def value_net_forward(x, w1, b1, w2, b2, *, tile_b=512, use_bf16=False):
    """x: (B, state_dim) f32; returns (B, 1) f32 == fc2(relu(fc1(x)))."""
    B, S = x.shape
    H = w1.shape[1]

    # Batch tile: multiple of 8 (f32 sublane), capped at the padded batch size.
    tile_b = min(_round_up(tile_b, 8), _round_up(B, 8))
    Bp = _round_up(B, tile_b)
    if Bp != B:
        x = jnp.pad(x, ((0, Bp - B), (0, 0)))  # padded rows are sliced off below

    if use_bf16:
        # Halve HBM read traffic for the streamed operand; accumulate in f32.
        x = x.astype(jnp.bfloat16)
        w1 = w1.astype(jnp.bfloat16)

    w2_row = w2.reshape(1, H).astype(jnp.float32)  # lane-dense row for VPU fc2
    b1 = b1.reshape(1, H).astype(jnp.float32)
    b2 = b2.reshape(1, 1).astype(jnp.float32)

    grid = (Bp // tile_b,)
    flops = 2 * Bp * (S * H + H)
    bytes_accessed = (
        Bp * S * x.dtype.itemsize       # x read
        + S * H * w1.dtype.itemsize     # w1 read (once)
        + H * 4 + H * 4 + 4             # b1, w2 row, b2
        + Bp * 4                        # output write
    )

    out = pl.pallas_call(
        value_net_kernel,
        out_shape=jax.ShapeDtypeStruct((Bp, 1), jnp.float32),
        grid=grid,
        in_specs=[
            pl.BlockSpec((tile_b, S), lambda i: (i, 0)),        # x: streamed tiles
            pl.BlockSpec((S, H), lambda i: (0, 0)),             # w1: VMEM-resident
            pl.BlockSpec((1, H), lambda i: (0, 0)),             # b1: VMEM-resident
            pl.BlockSpec((1, H), lambda i: (0, 0)),             # w2 row: VMEM-resident
            pl.BlockSpec(memory_space=pltpu.MemorySpace.SMEM),  # b2: scalar in SMEM
        ],
        out_specs=pl.BlockSpec((tile_b, 1), lambda i: (i, 0)),
        compiler_params=pltpu.CompilerParams(
            dimension_semantics=("parallel",),  # shard batch grid across TCs on v7x
        ),
        cost_estimate=pl.CostEstimate(
            flops=flops, transcendentals=0, bytes_accessed=bytes_accessed
        ),
    )(x, w1, b1, w2_row, b2)

    return out[:B]


def init_params(key, state_dim, hidden_dim):
    """Deterministic init mimicking PyTorch nn.Linear default U(-1/sqrt(fan_in), +)."""
    k1, k2, k3, k4 = jax.random.split(key, 4)
    bound1 = 1.0 / jnp.sqrt(jnp.float32(state_dim))
    bound2 = 1.0 / jnp.sqrt(jnp.float32(hidden_dim))
    # stored pre-transposed: (in_features, out_features)
    w1 = jax.random.uniform(k1, (state_dim, hidden_dim), jnp.float32, -bound1, bound1)
    b1 = jax.random.uniform(k2, (1, hidden_dim), jnp.float32, -bound1, bound1)
    w2 = jax.random.uniform(k3, (hidden_dim, 1), jnp.float32, -bound2, bound2)
    b2 = jax.random.uniform(k4, (1, 1), jnp.float32, -bound2, bound2)
    return w1, b1, w2, b2


if __name__ == "__main__":
    batch, state_dim, hidden_dim = 8, 8, 32

    key = jax.random.PRNGKey(0)
    kx, kp, kx2 = jax.random.split(key, 3)
    x = jax.random.normal(kx, (batch, state_dim), jnp.float32)
    w1, b1, w2, b2 = init_params(kp, state_dim, hidden_dim)

    # pure-JAX reference of the same forward pass
    ref = jnp.maximum(x @ w1 + b1, 0.0) @ w2 + b2

    # f32 path (exact semantics of the PyTorch module)
    out = jax.block_until_ready(value_net_forward(x, w1, b1, w2, b2))
    assert out.shape == (batch, 1)
    assert jnp.allclose(out, ref, atol=1e-5, rtol=1e-5)

    # padding path: batch not a multiple of the tile size
    x_odd = jax.random.normal(kx2, (batch + 3, state_dim), jnp.float32)
    ref_odd = jnp.maximum(x_odd @ w1 + b1, 0.0) @ w2 + b2
    out_odd = jax.block_until_ready(value_net_forward(x_odd, w1, b1, w2, b2))
    assert out_odd.shape == (batch + 3, 1)
    assert jnp.allclose(out_odd, ref_odd, atol=1e-5, rtol=1e-5)

    # bf16 input path (HBM-traffic optimization), looser tolerance
    out_bf16 = jax.block_until_ready(
        value_net_forward(x, w1, b1, w2, b2, use_bf16=True)
    )
    assert out_bf16.shape == (batch, 1)
    assert jnp.allclose(out_bf16, ref, atol=5e-2, rtol=5e-2)

    print("KERNEL_OK")
</pallas_src>

<mosaic_0001>
module attributes {stable_mosaic.version = 11 : i64} {
  func.func @value_net_kernel(%arg0: i32, %arg1: memref<8x8xf32, #tpu.memory_space<vmem>>, %arg2: memref<8x32xf32, #tpu.memory_space<vmem>>, %arg3: memref<1x32xf32, #tpu.memory_space<vmem>>, %arg4: memref<1x32xf32, #tpu.memory_space<vmem>>, %arg5: memref<1x1xf32, #tpu.memory_space<smem>>, %arg6: memref<8x1xf32, #tpu.memory_space<vmem>>) attributes {dimension_semantics = [#tpu.dimension_semantics<parallel>], iteration_bounds = array<i64: 1>, scalar_prefetch = 0 : i64, scratch_operands = 0 : i64, tpu.core_type = #tpu.core_type<tc>, window_params = [{transform_indices = @transform_0, window_bounds = array<i64: 8, 8>}, {pipeline_mode = #tpu.pipeline_mode<synchronous>, transform_indices = @transform_1, window_bounds = array<i64: 8, 32>}, {pipeline_mode = #tpu.pipeline_mode<synchronous>, transform_indices = @transform_2, window_bounds = array<i64: 1, 32>}, {pipeline_mode = #tpu.pipeline_mode<synchronous>, transform_indices = @transform_3, window_bounds = array<i64: 1, 32>}, {transform_indices = @transform_4, window_bounds = array<i64: 1, 1>}, {transform_indices = @transform_5, window_bounds = array<i64: 8, 1>}]} {
    %c0 = arith.constant 0 : index
    %c0_0 = arith.constant 0 : index
    %0 = vector.load %arg1[%c0, %c0_0] : memref<8x8xf32, #tpu.memory_space<vmem>>, vector<8x8xf32>
    %c0_1 = arith.constant 0 : index
    %c0_2 = arith.constant 0 : index
    %1 = vector.load %arg2[%c0_1, %c0_2] : memref<8x32xf32, #tpu.memory_space<vmem>>, vector<8x32xf32>
    %cst = arith.constant dense<0.000000e+00> : vector<8x32xf32>
    %2 = tpu.matmul %0, %1, %cst {dimension_numbers = #tpu.dot_dimension_numbers<[1], [0], [0], [1], [0, 0, 1, 1], [], []>} : vector<8x8xf32>, vector<8x32xf32>, vector<8x32xf32> -> vector<8x32xf32>
    %c0_3 = arith.constant 0 : index
    %c0_4 = arith.constant 0 : index
    %3 = vector.load %arg3[%c0_3, %c0_4] : memref<1x32xf32, #tpu.memory_space<vmem>>, vector<1x32xf32>
    %4 = vector.broadcast %3 : vector<1x32xf32> to vector<8x32xf32>
    %5 = arith.addf %2, %4 : vector<8x32xf32>
    %cst_5 = arith.constant 0.000000e+00 : f32
    %6 = vector.broadcast %cst_5 : f32 to vector<8x32xf32>
    %7 = arith.maximumf %5, %6 : vector<8x32xf32>
    %c0_6 = arith.constant 0 : index
    %c0_7 = arith.constant 0 : index
    %8 = vector.load %arg4[%c0_6, %c0_7] : memref<1x32xf32, #tpu.memory_space<vmem>>, vector<1x32xf32>
    %9 = vector.broadcast %8 : vector<1x32xf32> to vector<8x32xf32>
    %10 = arith.mulf %7, %9 : vector<8x32xf32>
    %cst_8 = arith.constant dense<0.000000e+00> : vector<8xf32>
    %11 = vector.multi_reduction <add>, %10, %cst_8 [1] : vector<8x32xf32> to vector<8xf32>
    %12 = vector.shape_cast %11 : vector<8xf32> to vector<8x1xf32>
    %c0_9 = arith.constant 0 : index
    %c0_10 = arith.constant 0 : index
    %13 = memref.load %arg5[%c0_9, %c0_10] : memref<1x1xf32, #tpu.memory_space<smem>>
    %14 = vector.broadcast %13 : f32 to vector<8x1xf32>
    %15 = arith.addf %12, %14 : vector<8x1xf32>
    %c0_11 = arith.constant 0 : index
    %c0_12 = arith.constant 0 : index
    %16 = vector.load %arg6[%c0_11, %c0_12] : memref<8x1xf32, #tpu.memory_space<vmem>>, vector<8x1xf32>
    tpu.vector_store %arg6[%c0_11, %c0_12], %15 {strides = array<i32>} : memref<8x1xf32, #tpu.memory_space<vmem>>, vector<8x1xf32>,
    return
  }
  func.func @transform_0(%arg0: i32) -> (i32, i32) {
    %c0_i32 = arith.constant 0 : i32
    %c0_i32_0 = arith.constant 0 : i32
    return %arg0, %c0_i32 : i32, i32
  }
  func.func @transform_1(%arg0: i32) -> (i32, i32) {
    %c0_i32 = arith.constant 0 : i32
    %c0_i32_0 = arith.constant 0 : i32
    %c0_i32_1 = arith.constant 0 : i32
    return %c0_i32, %c0_i32_0 : i32, i32
  }
  func.func @transform_2(%arg0: i32) -> (i32, i32) {
    %c0_i32 = arith.constant 0 : i32
    %c0_i32_0 = arith.constant 0 : i32
    %c0_i32_1 = arith.constant 0 : i32
    return %c0_i32, %c0_i32_0 : i32, i32
  }
  func.func @transform_3(%arg0: i32) -> (i32, i32) {
    %c0_i32 = arith.constant 0 : i32
    %c0_i32_0 = arith.constant 0 : i32
    %c0_i32_1 = arith.constant 0 : i32
    return %c0_i32, %c0_i32_0 : i32, i32
  }
  func.func @transform_4(%arg0: i32) -> (i32, i32) {
    %c0_i32 = arith.constant 0 : i32
    %c0_i32_0 = arith.constant 0 : i32
    %c0_i32_1 = arith.constant 0 : i32
    return %c0_i32, %c0_i32_0 : i32, i32
  }
  func.func @transform_5(%arg0: i32) -> (i32, i32) {
    %c0_i32 = arith.constant 0 : i32
    %c0_i32_0 = arith.constant 0 : i32
    return %arg0, %c0_i32 : i32, i32
  }
}

</mosaic_0001>

<bundles_post_ra>
// kernel: tpu_custom_call.1
= control target key start
LH: loop header
LB: loop body
LE: loop exit
PB: predicated region body
PF: predicated region fallthrough
CT: control target
= control target key end

     0   :  { %11 = vsyncpa [#allocation4], 0  ;;  %s284_s0 = inlined_call_operand.hbm [shape: f32[8,8], index: 0, kind: input, shape index: {}]   ;;  %s285_s1 = inlined_call_operand.hbm [shape: f32[8,32], index: 1, kind: input, shape index: {}]   ;;  %s286_s2 = inlined_call_operand.vmem [shape: f32[1,32], index: 2, kind: input, shape index: {}]   ;;  %s287_s3 = inlined_call_operand.vmem [shape: f32[1,32], index: 3, kind: input, shape index: {}]   ;;  %s288_s4 = inlined_call_operand.<no memory space> [shape: f32[1,1], index: 4, kind: input, shape index: {}]   ;;  %s289_s5 = inlined_call_operand.vmem [shape: f32[8,1], index: 5, kind: output, shape index: {}]  }
   0x1   :  { %12 = vsyncpa [#allocation6], 0  ;;  %s214_s18 = smov [#allocation3]   ;;  %s215_s20 = smov [#allocation5]  }
   0x2   :  { %s19_s19 = sshll.u32 %s214_s18, 4  ;;  %s29_s21 = sshll.u32 %s215_s20, 4  ;;  %s20_s19 = int_to_ptr.vmem [resolvable:$true] %s19_s19  ;;  %s30_s21 = int_to_ptr.vmem [resolvable:$true] %s29_s21 }
   0x3   :  { %s166_s24 = scalar_lea.hbm %s284_s0, 128 }
   0x4   :  { %p167_p0 = scmp.ne.s32.totalorder %s284_s0, %s166_s24  ;;  %p170_p1 = scmp.lt.u32.totalorder %s166_s24, %s284_s0 }
   0x6   :  { %p172_p2 = pnand %p170_p1, %p167_p0 }
   0x8   :  { %175 = shalt.err (!%p172_p2)
}
   0x9   :  { %s176_s29 = scalar_lea.vmem %s20_s19, 128  ;;  %p181_p4 = scmp.lt.s32.totalorder %s20_s19, %s20_s19 }
   0xa   :  { %p177_p3 = scmp.ne.s32.totalorder %s20_s19, %s176_s29  ;;  %p182_p5 = scmp.lt.s32.totalorder %s176_s29, %s176_s29 }
   0xc   :  { %p183_p6 = por %p182_p5, %p181_p4 }
   0xe   :  { %p184_p7 = pnand %p183_p6, %p177_p3 }
  0x10   :  { %187 = shalt.err (!%p184_p7)
}
  0x11   :  { %22 = dma.hbm_to_vmem [thread:$0]  %s284_s0, 128, %s20_s19, [#allocation4]  }
  0x12   :  { %s188_s9 = scalar_lea.hbm %s285_s1, 128 }
  0x13   :  { %p189_p8 = scmp.ne.s32.totalorder %s285_s1, %s188_s9  ;;  %p192_p9 = scmp.lt.u32.totalorder %s188_s9, %s285_s1 }
  0x15   :  { %p194_p10 = pnand %p192_p9, %p189_p8 }
  0x17   :  { %197 = shalt.err (!%p194_p10)
}
  0x18   :  { %s198_s14 = scalar_lea.vmem %s30_s21, 128  ;;  %p203_p12 = scmp.lt.s32.totalorder %s30_s21, %s30_s21 }
  0x19   :  { %p199_p11 = scmp.ne.s32.totalorder %s30_s21, %s198_s14  ;;  %p204_p13 = scmp.lt.s32.totalorder %s198_s14, %s198_s14 }
  0x1b   :  { %p205_p0 = por %p204_p13, %p203_p12 }
  0x1d   :  { %p206_p1 = pnand %p205_p0, %p199_p11 }
  0x1f   :  { %209 = shalt.err (!%p206_p1)
}
  0x20   :  { %32 = dma.hbm_to_vmem [thread:$0]  %s285_s1, 128, %s30_s21, [#allocation6]  }
  0x21   :  { %210 = dma.done.wait [#allocation4], 128  }
  0x22   :  { %211 = vsyncadd [#allocation4], 4294967168 }
  0x23   :  { %212 = dma.done.wait [#allocation6], 128  }
  0x24   :  { %213 = vsyncadd [#allocation6], 4294967168  ;;  %v216_v0 = vmov 0.0   ;;  %vm217_vm0 = vmmov 0   ;;  %vm54_vm1 = vcmask 64512   ;;  %v46_v1 = vld [vmem:[#allocation5] sm:$0xff]  ;;  %v142_v11 = vstv %s288_s4 }
  0x25   :  { %157 = vmatprep.subr.mxu0 %v216_v0  ;;  %159 = vmatprep.mubr.msk.f32.mxu0 %vm217_vm0, %v216_v0  ;;  %v45_v2 = vld [vmem:[#allocation3] sm:$0xff]  ;;  %vm137_vm2 = vcmask 261120   ;;  %vm144_vm3 = vcmask 7168  }
  0x26   :  { %158 = vmatpush3.msra.mxu0 %v46_v1  ;;  %v152_v3 = vld [vmem:[%s286_s2] ss:$0 sm:$0xff] }
  0x27   :  { %160 = vmatmul.mubr.msk.f32.vlgmr.msra.gmra.mrb[0].mxu0 %vm54_vm1, %v45_v2  ;;  %v154_v7 = vld [vmem:[%s287_s3] ss:$0 sm:$0xff] }
  0xfa   :  { %v124_v4 = vpop.f32.mrb[0].mxu0 }
  0xfb   :  { %v125_v5 = vadd.f32 %v152_v3, %v124_v4  ;;  %v161_v6 = vpop.f32.mrb[1].mxu0 }
  0xfd   :  { %v128_v8 = vmax.f32 %v125_v5, 0.0 }
  0xff   :  { %v136_v9 = vmul.f32 %v154_v7, %v128_v8 }
 0x101   :  { %v138_v10 = vsel %vm137_vm2, %v136_v9, 0.0 }
 0x102   :  { %139 = vadd.xlane.f32.xlu0 %v138_v10 }
 0x18f   :  { %v140_v12 = vpop.xlane.xlu0 %139 }
 0x190   :  { %v143_v13 = vadd.f32 %v142_v11, %v140_v12 }
 0x192   :  { %145 = vst.msk [vmem:[%s289_s5] sm:$0xff] %vm144_vm3, %v143_v13 }
 0x193   :  { %150 = vsyncpa [#allocation4], 1 }
 0x194   :  { %151 = vsyncpa [#allocation6], 1 }

</bundles_post_ra>
